<compile_context>
chip_gen: v6e
topology: v6e:2x2x1
jax: 0.10.0
libtpu: 0.0.40
codegen_flags: <defaults>
</compile_context>

<pallas_src>
import numpy as np
import jax
import jax.numpy as jnp
from jax.experimental import pallas as pl
from jax.experimental.pallas import tpu as pltpu


def conv_transpose2d_pallas(x_nchw, weight, bias, stride, padding):
    """ConvTranspose2d (groups=1, output_padding=0) with torch semantics.

    x_nchw : (N, Cin, H, W)
    weight : (Cin, Cout, kH, kW)   -- torch ConvTranspose2d weight layout
    bias   : (Cout,)
    """
    N, Cin, H, W = x_nchw.shape
    Cin_w, Cout, kH, kW = weight.shape
    assert Cin_w == Cin
    s, p = int(stride), int(padding)

    H_out = (H - 1) * s - 2 * p + kH
    W_out = (W - 1) * s - 2 * p + kW
    HW = H_out * W_out
    KKC = kH * kW * Cin

    # ---- glue (plain JAX, fuses to one XLA op): dilate, pad/crop, im2col ----
    x = x_nchw
    if s > 1:
        xd = jnp.zeros((N, Cin, (H - 1) * s + 1, (W - 1) * s + 1), x.dtype)
        x = xd.at[:, :, ::s, ::s].set(x)

    pe_h, pe_w = kH - 1 - p, kW - 1 - p
    ch, cw = max(-pe_h, 0), max(-pe_w, 0)      # torch crops when pad > k-1
    ph, pw = max(pe_h, 0), max(pe_w, 0)
    if ch or cw:
        x = x[:, :, ch:x.shape[2] - ch, cw:x.shape[3] - cw]
    if ph or pw:
        x = jnp.pad(x, ((0, 0), (0, 0), (ph, ph), (pw, pw)))
    # x is now the zero-padded, dilated image: (N, Cin, H_out+kH-1, W_out+kW-1)

    # im2col, tap-major / channel-minor rows, spatial flattened on the lane dim:
    #   patches[n, (kh*kW+kw)*Cin + ci, h*W_out + w] = x[n, ci, h+kh, w+kw]
    taps = [x[:, :, kh:kh + H_out, kw:kw + W_out]
            for kh in range(kH) for kw in range(kW)]
    patches = jnp.stack(taps, axis=1).reshape(N, KKC, HW)

    # Effective forward-conv weight as a single (Cout, KKC) slab matching the
    # patch-row ordering:  w_eff[kh, kw, ci, co] = weight[ci, co, kH-1-kh, kW-1-kw]
    w_eff = jnp.transpose(weight[:, :, ::-1, ::-1], (2, 3, 0, 1))
    w_mat = w_eff.reshape(KKC, Cout).T                     # (Cout, KKC)
    b2d = bias.reshape(Cout, 1).astype(jnp.float32)        # broadcast over lanes

    # ---- Pallas kernel: single fused K=KKC matmul, lane-dense output --------
    def kernel(p_ref, w_ref, b_ref, o_ref):
        acc = jnp.dot(w_ref[...], p_ref[0],
                      preferred_element_type=jnp.float32)   # (Cout, HW)
        o_ref[0] = (acc + b_ref[...]).astype(o_ref.dtype)

    out_flat = pl.pallas_call(
        kernel,
        out_shape=jax.ShapeDtypeStruct((N, Cout, HW), x_nchw.dtype),
        grid=(N,),
        in_specs=[
            pl.BlockSpec((1, KKC, HW), lambda n: (n, 0, 0)),
            pl.BlockSpec((Cout, KKC), lambda n: (0, 0)),   # resident weights
            pl.BlockSpec((Cout, 1), lambda n: (0, 0)),     # resident bias
        ],
        out_specs=pl.BlockSpec((1, Cout, HW), lambda n: (n, 0, 0)),
        compiler_params=pltpu.CompilerParams(
            dimension_semantics=("parallel",)),
    )(patches, w_mat, b2d)

    # Free (metadata-only) reshape: (N, Cout, HW) -> (N, Cout, H_out, W_out).
    return out_flat.reshape(N, Cout, H_out, W_out)


def ref_conv_transpose2d_np(x, w, b, s, p):
    """Independent scatter-based reference (torch ConvTranspose2d semantics)."""
    N, Cin, H, W = x.shape
    _, Cout, kH, kW = w.shape
    H_out = (H - 1) * s - 2 * p + kH
    W_out = (W - 1) * s - 2 * p + kW
    y = np.zeros((N, Cout, H_out + 2 * p, W_out + 2 * p), np.float32)
    for n in range(N):
        for ci in range(Cin):
            for i in range(H):
                for j in range(W):
                    y[n, :, i * s:i * s + kH, j * s:j * s + kW] += (
                        x[n, ci, i, j] * w[ci])
    y = y[:, :, p:p + H_out, p:p + W_out]
    return y + b.reshape(1, Cout, 1, 1)


if __name__ == "__main__":
    # Original conv: Conv2d(in=4, out=8, k=3, stride=1, padding=1, bias=True)
    # => ConvTran2dCir input has 8 channels, output has 4 channels.
    N, C_in_T, C_out_T, H, W = 2, 8, 4, 16, 16
    kH = kW = 3
    stride, padding = 1, 1

    key = jax.random.PRNGKey(0)
    kx, kw_, kb = jax.random.split(key, 3)
    # weight uses torch ConvTranspose2d layout (Cin_T, Cout_T, kH, kW)
    fan = C_out_T * kH * kW
    bound = 1.0 / np.sqrt(fan)
    weight = jax.random.uniform(kw_, (C_in_T, C_out_T, kH, kW),
                                jnp.float32, -bound, bound)
    bias = jax.random.uniform(kb, (C_out_T,), jnp.float32, -bound, bound)
    x = jax.random.normal(kx, (N, C_in_T, H, W), jnp.float32)

    fwd = jax.jit(lambda xx, ww, bb: conv_transpose2d_pallas(
        xx, ww, bb, stride, padding))
    out = jax.block_until_ready(fwd(x, weight, bias))

    ref = ref_conv_transpose2d_np(np.asarray(x), np.asarray(weight),
                                  np.asarray(bias), stride, padding)
    assert out.shape == ref.shape, (out.shape, ref.shape)
    np.testing.assert_allclose(np.asarray(out), ref, atol=1e-4, rtol=1e-4)
    print("KERNEL_OK")
</pallas_src>

<mosaic_0001>
module attributes {stable_mosaic.version = 11 : i64} {
  func.func @kernel(%arg0: i32, %arg1: memref<1x72x256xf32, #tpu.memory_space<vmem>>, %arg2: memref<4x72xf32, #tpu.memory_space<vmem>>, %arg3: memref<4x1xf32, #tpu.memory_space<vmem>>, %arg4: memref<1x4x256xf32, #tpu.memory_space<vmem>>) attributes {dimension_semantics = [#tpu.dimension_semantics<parallel>], iteration_bounds = array<i64: 2>, scalar_prefetch = 0 : i64, scratch_operands = 0 : i64, tpu.core_type = #tpu.core_type<tc>, window_params = [{transform_indices = @transform_0, window_bounds = array<i64: 1, 72, 256>}, {pipeline_mode = #tpu.pipeline_mode<synchronous>, transform_indices = @transform_1, window_bounds = array<i64: 4, 72>}, {pipeline_mode = #tpu.pipeline_mode<synchronous>, transform_indices = @transform_2, window_bounds = array<i64: 4, 1>}, {transform_indices = @transform_3, window_bounds = array<i64: 1, 4, 256>}]} {
    %c0 = arith.constant 0 : index
    %c0_0 = arith.constant 0 : index
    %0 = vector.load %arg2[%c0, %c0_0] : memref<4x72xf32, #tpu.memory_space<vmem>>, vector<4x72xf32>
    %c0_1 = arith.constant 0 : index
    %c0_2 = arith.constant 0 : index
    %c0_3 = arith.constant 0 : index
    %1 = vector.load %arg1[%c0_1, %c0_2, %c0_3] : memref<1x72x256xf32, #tpu.memory_space<vmem>>, vector<1x72x256xf32>
    %2 = vector.shape_cast %1 : vector<1x72x256xf32> to vector<72x256xf32>
    %cst = arith.constant dense<0.000000e+00> : vector<4x256xf32>
    %3 = tpu.matmul %0, %2, %cst {dimension_numbers = #tpu.dot_dimension_numbers<[1], [0], [0], [1], [0, 0, 1, 1], [], []>} : vector<4x72xf32>, vector<72x256xf32>, vector<4x256xf32> -> vector<4x256xf32>
    %c0_4 = arith.constant 0 : index
    %c0_5 = arith.constant 0 : index
    %4 = vector.load %arg3[%c0_4, %c0_5] : memref<4x1xf32, #tpu.memory_space<vmem>>, vector<4x1xf32>
    %5 = vector.broadcast %4 : vector<4x1xf32> to vector<4x256xf32>
    %6 = arith.addf %3, %5 : vector<4x256xf32>
    %c0_6 = arith.constant 0 : index
    %c0_7 = arith.constant 0 : index
    %c0_8 = arith.constant 0 : index
    %7 = vector.load %arg4[%c0_6, %c0_7, %c0_8] : memref<1x4x256xf32, #tpu.memory_space<vmem>>, vector<1x4x256xf32>
    %8 = vector.shape_cast %7 : vector<1x4x256xf32> to vector<4x256xf32>
    %9 = vector.shape_cast %6 : vector<4x256xf32> to vector<1x4x256xf32>
    tpu.vector_store %arg4[%c0_6, %c0_7, %c0_8], %9 {strides = array<i32>} : memref<1x4x256xf32, #tpu.memory_space<vmem>>, vector<1x4x256xf32>,
    return
  }
  func.func @transform_0(%arg0: i32) -> (i32, i32, i32) {
    %c0_i32 = arith.constant 0 : i32
    %c0_i32_0 = arith.constant 0 : i32
    %c0_i32_1 = arith.constant 0 : i32
    return %arg0, %c0_i32, %c0_i32_0 : i32, i32, i32
  }
  func.func @transform_1(%arg0: i32) -> (i32, i32) {
    %c0_i32 = arith.constant 0 : i32
    %c0_i32_0 = arith.constant 0 : i32
    %c0_i32_1 = arith.constant 0 : i32
    return %c0_i32, %c0_i32_0 : i32, i32
  }
  func.func @transform_2(%arg0: i32) -> (i32, i32) {
    %c0_i32 = arith.constant 0 : i32
    %c0_i32_0 = arith.constant 0 : i32
    %c0_i32_1 = arith.constant 0 : i32
    return %c0_i32, %c0_i32_0 : i32, i32
  }
  func.func @transform_3(%arg0: i32) -> (i32, i32, i32) {
    %c0_i32 = arith.constant 0 : i32
    %c0_i32_0 = arith.constant 0 : i32
    %c0_i32_1 = arith.constant 0 : i32
    return %arg0, %c0_i32, %c0_i32_0 : i32, i32, i32
  }
}

</mosaic_0001>

<bundles_post_ra>
// kernel: _lambda_.1
= control target key start
LH: loop header
LB: loop body
LE: loop exit
PB: predicated region body
PF: predicated region fallthrough
CT: control target
= control target key end

     0   :  { %s385_s12 = smov 0   ;;  %s432_s0 = inlined_call_operand.vmem [shape: f32[2,72,256], index: 0, kind: input, shape index: {}]   ;;  %s433_s1 = inlined_call_operand.vmem [shape: f32[4,72], index: 1, kind: input, shape index: {}]   ;;  %s434_s2 = inlined_call_operand.vmem [shape: f32[4,1], index: 2, kind: input, shape index: {}]   ;;  %s435_s3 = inlined_call_operand.vmem [shape: f32[2,4,256], index: 3, kind: output, shape index: {}]  }
   0x1 LB: > { %s331_s13 = sadd.s32 4294967295, %s361_s12   ;;  %p335_p0 = scmp.ge.s32.totalorder %s361_s12, 1  ;;  %s361_s12 = sphi %s385_s12, %s13_s12  }
   0x2   : > { %p137_p1 = scmp.lt.s32.totalorder %s361_s12, 3 }
   0x4   : > { %p138_p2 = pnand %p335_p0, %p137_p1 }
   0x5   : > { %p161_p3 = scmp.lt.s32.totalorder (!%p138_p2), %s331_s13, 1 }
   0x6   : > { %141 = sbr.rel (%p138_p2) target bundleno = 234 (0xea), region = 32 }
   0xb   : > { %v363_v0 = vmov 0.0   ;;  %v364_v1 = vmov 0   ;;  %v190_v2 = vld [vmem:[%s434_s2] sm:$0xf]  ;;  %s437_s13 = smov (!%p161_p3, %s331_s13), 1  ;;  %vm196_vm0 = vcmask 588800  }
   0xc   : > { %264 = vmatprep.mubr.f32.mxu0 %v363_v0  ;;  %354 = vset.pattern.permute.xlu0 %v364_v1  ;;  %s343_s16 = smul.u32 144, %s437_s13  ;;  %v171_v21 = vld [vmem:[%s433_s1] sm:$0xf]  ;;  %s342_s22 = sshll.u32 %s437_s13, 3 }
   0xd   : > { %193 = vperm.xlu0 %354, %v190_v2   ;;  %s170_s25 = scalar_lea.vmem %s435_s3, %s342_s22 }
   0xe   : > { %s402_s19 = scalar_lea.vmem %s432_s0, %s343_s16 }
   0xf   : > { %v189_v3 = vld [vmem:[%s402_s19 + $0x88] sm:$0xff]  ;;  %v188_v4 = vld [vmem:[%s402_s19 + $0x80] sm:$0xff]  ;;  %v187_v5 = vld [vmem:[%s402_s19 + $0x78] sm:$0xff] }
  0x10   : > { %214 = vmatprep.subr.mxu0 %v189_v3  ;;  %v186_v6 = vld [vmem:[%s402_s19 + $0x70] sm:$0xff]  ;;  %v185_v7 = vld [vmem:[%s402_s19 + $0x68] sm:$0xff]  ;;  %v184_v8 = vld [vmem:[%s402_s19 + $0x60] sm:$0xff] }
  0x11   : > { %215 = vmatpush1.msra.mxu0 %v188_v4  ;;  %v183_v9 = vld [vmem:[%s402_s19 + $0x58] sm:$0xff]  ;;  %v182_v10 = vld [vmem:[%s402_s19 + $0x50] sm:$0xff]  ;;  %v181_v11 = vld [vmem:[%s402_s19 + $0x48] sm:$0xff] }
  0x12   : > { %216 = vmatprep.subr.mxu0 %v187_v5  ;;  %v180_v12 = vld [vmem:[%s402_s19 + $0x40] sm:$0xff]  ;;  %v179_v13 = vld [vmem:[%s402_s19 + $0x38] sm:$0xff]  ;;  %v178_v14 = vld [vmem:[%s402_s19 + $0x30] sm:$0xff] }
  0x13   : > { %217 = vmatpush1.msra.mxu0 %v186_v6  ;;  %v177_v15 = vld [vmem:[%s402_s19 + $0x28] sm:$0xff]  ;;  %v176_v16 = vld [vmem:[%s402_s19 + $0x20] sm:$0xff]  ;;  %v175_v17 = vld [vmem:[%s402_s19 + $0x18] sm:$0xff] }
  0x14   : > { %218 = vmatprep.subr.mxu0 %v185_v7  ;;  %v174_v18 = vld [vmem:[%s402_s19 + $0x10] sm:$0xff]  ;;  %v173_v19 = vld [vmem:[%s402_s19 + $0x8] sm:$0xff]  ;;  %v172_v20 = vld [vmem:[%s402_s19] sm:$0xff] }
  0x15   : > { %219 = vmatpush1.msra.mxu0 %v184_v8 }
  0x16   : > { %220 = vmatprep.subr.mxu0 %v183_v9 }
  0x17   : > { %221 = vmatpush1.msra.mxu0 %v182_v10 }
  0x18   : > { %222 = vmatprep.subr.mxu0 %v181_v11 }
  0x19   : > { %223 = vmatpush1.msra.mxu0 %v180_v12 }
  0x1a   : > { %224 = vmatprep.subr.mxu0 %v179_v13 }
  0x1b   : > { %225 = vmatpush1.msra.mxu0 %v178_v14 }
  0x1c   : > { %226 = vmatprep.subr.mxu0 %v177_v15 }
  0x1d   : > { %227 = vmatpush1.msra.mxu0 %v176_v16 }
  0x1e   : > { %228 = vmatprep.subr.mxu0 %v175_v17 }
  0x1f   : > { %229 = vmatpush1.msra.mxu0 %v174_v18 }
  0x20   : > { %230 = vmatprep.subr.mxu0 %v173_v19 }
  0x21   : > { %231 = vmatpush1.msra.mxu0 %v172_v20 }
  0x22   : > { %339 = vmatmul.mubr.msk.f32.vlgmr.msra.gmra.mxu0 %vm196_vm0, %v171_v21 }
  0x88   : > { %v194_v22 = vpop.permute.xlu0 %193 }
  0xe2   : > { %v266_v23 = vpop.f32.mrf.mxu0 }
  0xe3   : > { %v267_v25 = vadd.f32 %v266_v23, %v194_v22 }
  0xe4   : > { %v268_v24 = vpop.f32.mrf.mxu0 }
  0xe5   : > { %v269_v26 = vadd.f32 %v268_v24, %v194_v22 }
  0xe7   : > { %v273_v27 = vcombine.low %v267_v25, %v269_v26 }
  0xe9   : > { %275 = vst [vmem:[%s170_s25] sm:$0xff] %v273_v27 }
  0xea PF: > { %s13_s12 = sadd.s32 1, %s361_s12  }
  0xeb   : > { %p10_p4 = scmp.ge.s32.totalorder %s13_s12, 4  }
  0xed   :  { %12 = sbr.rel (!%p10_p4) target bundleno = 1 (0x1), region = 62 }

</bundles_post_ra>
